<compile_context>
chip_gen: v5e
topology: v5e:2x2
jax: 0.10.0
libtpu: 0.0.40
codegen_flags: <defaults>
</compile_context>

<pallas_src>
import math

import numpy as np
import jax
import jax.numpy as jnp
from jax.experimental import pallas as pl
from jax.experimental.pallas import tpu as pltpu

OUT0 = 6   # first adaptive pool output size
OUT1 = 1   # second adaptive pool output size

_LANE = 128
_SUBLANE = 8
_MXU_PASSES = 3          # bf16_3x: hi*hi + hi*lo + lo*hi
_MAX_W_BYTES = 2 << 20   # cap on the block-diagonal weight matrix (f32 equivalent)


def _adaptive_bins(L, O):
    """PyTorch AdaptiveAvgPool1d bin boundaries: [floor(i*L/O), ceil((i+1)*L/O))."""
    return [((i * L) // O, -(-((i + 1) * L) // O)) for i in range(O)]


def _weight_vector(L):
    """w[j] = sum over bins containing j of 1/(OUT0 * bin_width) (bins may overlap)."""
    w = np.zeros((L,), dtype=np.float32)
    for s, e in _adaptive_bins(L, OUT0):
        w[s:e] += 1.0 / (OUT0 * (e - s))
    return w


def _round_up(a, b):
    return ((a + b - 1) // b) * b


def _choose_pack(L):
    """Rows folded into the lane axis.

    k*L must be a multiple of 128 (lane-dense loads, bitcast-able reshape from (M,L)).
    k*L >= 256 fills the 256-deep MXU feed; ~512 is enough -- growing k further only
    widens the (tiny) output while inflating the (k*L, k) weight matrix.
    Falls back to k=1 (no packing) when the weight matrix would get large (big odd L).
    """
    k = _LANE // math.gcd(L, _LANE)          # smallest k with (k*L) % 128 == 0
    while k * L < 256:
        k *= 2
    if k * L < 512 and k < _LANE:
        k *= 2
    if k * k * L * 4 > _MAX_W_BYTES:
        return 1                             # fallback: plain (tile_m, L) blocks
    return k


def _block_diag_weights(L, k):
    """Block-diagonal weights, pre-split into bf16 hi/lo parts (trace-time constants)."""
    w = _weight_vector(L)
    W = np.zeros((k * L, k), dtype=np.float32)
    for g in range(k):
        W[g * L:(g + 1) * L, g] = w
    Wf = jnp.asarray(W)
    W_hi = Wf.astype(jnp.bfloat16)
    W_lo = (Wf - W_hi.astype(jnp.float32)).astype(jnp.bfloat16)
    return W_hi, W_lo


def _block_bytes():
    """Per-grid-step input block budget (bigger on v7x: 3.2 TB/s HBM, 64 MiB VMEM)."""
    try:
        vmem = getattr(pltpu.get_tpu_info(), "vmem_capacity_bytes", 128 << 20)
    except Exception:
        vmem = 128 << 20
    return (8 << 20) if vmem <= (64 << 20) else (4 << 20)


def _pool_kernel(x_ref, w_hi_ref, w_lo_ref, o_ref):
    # x_ref: (tile_m, kL) f32; w_*_ref: (kL, k) bf16 block-diagonal; o_ref: (tile_m, k).
    # Manual bf16_3x: three single-pass bf16 MXU matmuls with f32 accumulation
    # (half the passes of a full-f32 HIGHEST matmul, error ~1e-6).
    x = x_ref[...]
    x_hi = x.astype(jnp.bfloat16)
    x_lo = (x - x_hi.astype(jnp.float32)).astype(jnp.bfloat16)
    acc = jnp.dot(x_hi, w_hi_ref[...], preferred_element_type=jnp.float32)
    acc = acc + jnp.dot(x_lo, w_hi_ref[...], preferred_element_type=jnp.float32)
    acc = acc + jnp.dot(x_hi, w_lo_ref[...], preferred_element_type=jnp.float32)
    o_ref[...] = acc


def _run_pool(x_packed, W_hi, W_lo, tile_m):
    """One pallas_call over an exactly-tiled packed array (rows % tile_m == 0)."""
    rows, kL = x_packed.shape
    k = W_hi.shape[1]
    grid = (rows // tile_m,)

    # Double-buffered input/weights/output (weights are tiny, so 2x buffering is fine).
    in_flight = 2 * (tile_m * kL * 4 + 2 * kL * k * 2 + tile_m * k * 4)
    vmem_limit = int(min(64 << 20, max(16 << 20, 2 * in_flight)))

    return pl.pallas_call(
        _pool_kernel,
        out_shape=jax.ShapeDtypeStruct((rows, k), jnp.float32),
        grid=grid,
        in_specs=[
            pl.BlockSpec((tile_m, kL), lambda i: (i, 0)),   # pipelined over rows
            pl.BlockSpec((kL, k), lambda i: (0, 0)),        # constant weight blocks
            pl.BlockSpec((kL, k), lambda i: (0, 0)),
        ],
        out_specs=pl.BlockSpec((tile_m, k), lambda i: (i, 0)),
        compiler_params=pltpu.CompilerParams(
            dimension_semantics=("parallel",),              # megacore split on v7x
            vmem_limit_bytes=vmem_limit,
        ),
        cost_estimate=pl.CostEstimate(
            flops=2 * rows * kL * k * _MXU_PASSES,          # actual MXU work
            transcendentals=0,
            bytes_accessed=rows * kL * 4 + 2 * kL * k * 2 + rows * k * 4,
        ),
    )(x_packed, W_hi, W_lo)


def model_forward(x):
    """AdaptiveAvgPool1d(6) -> AdaptiveAvgPool1d(1).  x: (N, C, L) -> (N, C, 1) f32."""
    N, C, L = x.shape
    M = N * C
    x2d = x.reshape(M, L).astype(jnp.float32)          # merging leading dims is free

    # --- trace-time constants ----------------------------------------------------------
    k = _choose_pack(L)
    kL = k * L
    W_hi, W_lo = _block_diag_weights(L, k)

    # --- row tiling: ~4-8 MiB input block, multiple of 8, >= 2 grid steps if possible ---
    rows_total = -(-M // k)
    budget_rows = max(_SUBLANE, (_block_bytes() // (kL * 4)) // _SUBLANE * _SUBLANE)
    tile_m = min(budget_rows, _round_up(rows_total, _SUBLANE))
    if rows_total >= 2 * _SUBLANE:                      # keep both v7x TCs busy
        tile_m = min(tile_m, _round_up(-(-rows_total // 2), _SUBLANE))
    tile_m = max(_SUBLANE, tile_m // _SUBLANE * _SUBLANE)

    # --- bulk: largest prefix that packs with NO padding (free reshape, no jnp.pad) ----
    chunk = k * tile_m                                  # original rows per grid step
    M_bulk = (M // chunk) * chunk
    M_tail = M - M_bulk

    parts = []
    if M_bulk:
        xb = x2d if M_bulk == M else x2d[:M_bulk]       # contiguous prefix (layout-preserving)
        xb = xb.reshape(M_bulk // k, kL)
        parts.append(_run_pool(xb, W_hi, W_lo, tile_m).reshape(M_bulk))

    if M_tail:
        # Ragged tail (< one block of rows): pad with explicit zeros -- never garbage,
        # since 0*Inf would poison valid output columns through the block-diag matmul.
        rows_t = _round_up(-(-M_tail // k), _SUBLANE)
        xt = jnp.pad(x2d[M_bulk:], ((0, rows_t * k - M_tail), (0, 0)))
        xt = xt.reshape(rows_t, kL)
        parts.append(_run_pool(xt, W_hi, W_lo, rows_t).reshape(rows_t * k)[:M_tail])

    y = parts[0] if len(parts) == 1 else jnp.concatenate(parts, axis=0)
    return y.reshape(N, C, OUT1)


def _reference(x):
    """Pure-JAX reference: AdaptiveAvgPool1d(6) -> AdaptiveAvgPool1d(1) (bin-based)."""
    N, C, L = x.shape
    p0 = jnp.stack(
        [jnp.mean(x[:, :, s:e], axis=2) for s, e in _adaptive_bins(L, OUT0)], axis=2
    )  # (N, C, 6)
    return jnp.mean(p0, axis=2, keepdims=True)  # (N, C, 1)


if __name__ == "__main__":
    key = jax.random.PRNGKey(0)
    N, C, L = 2, 4, 16   # L % 6 != 0 -> overlapping adaptive bins are exercised
    x = jax.random.uniform(key, (N, C, L), dtype=jnp.float32)

    fwd = jax.jit(model_forward)
    y = jax.block_until_ready(fwd(x))

    y_ref = _reference(x)
    assert y.shape == (N, C, 1), y.shape
    assert jnp.allclose(y, y_ref, atol=1e-5, rtol=1e-5), "mismatch vs reference"

    print("KERNEL_OK")
</pallas_src>

<mosaic_0001>
module attributes {stable_mosaic.version = 11 : i64} {
  func.func @_pool_kernel(%arg0: i32, %arg1: memref<8x512xf32, #tpu.memory_space<vmem>>, %arg2: memref<512x32xbf16, #tpu.memory_space<vmem>>, %arg3: memref<512x32xbf16, #tpu.memory_space<vmem>>, %arg4: memref<8x32xf32, #tpu.memory_space<vmem>>) attributes {dimension_semantics = [#tpu.dimension_semantics<parallel>], iteration_bounds = array<i64: 1>, scalar_prefetch = 0 : i64, scratch_operands = 0 : i64, tpu.core_type = #tpu.core_type<tc>, window_params = [{transform_indices = @transform_0, window_bounds = array<i64: 8, 512>}, {pipeline_mode = #tpu.pipeline_mode<synchronous>, transform_indices = @transform_1, window_bounds = array<i64: 512, 32>}, {pipeline_mode = #tpu.pipeline_mode<synchronous>, transform_indices = @transform_2, window_bounds = array<i64: 512, 32>}, {transform_indices = @transform_3, window_bounds = array<i64: 8, 32>}]} {
    %c0 = arith.constant 0 : index
    %c0_0 = arith.constant 0 : index
    %0 = vector.load %arg1[%c0, %c0_0] : memref<8x512xf32, #tpu.memory_space<vmem>>, vector<8x512xf32>
    %1 = arith.truncf %0 : vector<8x512xf32> to vector<8x512xbf16>
    %2 = arith.extf %1 : vector<8x512xbf16> to vector<8x512xf32>
    %3 = arith.subf %0, %2 : vector<8x512xf32>
    %4 = arith.truncf %3 : vector<8x512xf32> to vector<8x512xbf16>
    %c0_1 = arith.constant 0 : index
    %c0_2 = arith.constant 0 : index
    %5 = vector.load %arg2[%c0_1, %c0_2] : memref<512x32xbf16, #tpu.memory_space<vmem>>, vector<512x32xbf16>
    %cst = arith.constant dense<0.000000e+00> : vector<8x32xf32>
    %6 = tpu.matmul %1, %5, %cst {dimension_numbers = #tpu.dot_dimension_numbers<[1], [0], [0], [1], [0, 0, 1, 1], [], []>} : vector<8x512xbf16>, vector<512x32xbf16>, vector<8x32xf32> -> vector<8x32xf32>
    %c0_3 = arith.constant 0 : index
    %c0_4 = arith.constant 0 : index
    %7 = vector.load %arg2[%c0_3, %c0_4] : memref<512x32xbf16, #tpu.memory_space<vmem>>, vector<512x32xbf16>
    %cst_5 = arith.constant dense<0.000000e+00> : vector<8x32xf32>
    %8 = tpu.matmul %4, %7, %cst_5 {dimension_numbers = #tpu.dot_dimension_numbers<[1], [0], [0], [1], [0, 0, 1, 1], [], []>} : vector<8x512xbf16>, vector<512x32xbf16>, vector<8x32xf32> -> vector<8x32xf32>
    %9 = arith.addf %6, %8 : vector<8x32xf32>
    %c0_6 = arith.constant 0 : index
    %c0_7 = arith.constant 0 : index
    %10 = vector.load %arg3[%c0_6, %c0_7] : memref<512x32xbf16, #tpu.memory_space<vmem>>, vector<512x32xbf16>
    %cst_8 = arith.constant dense<0.000000e+00> : vector<8x32xf32>
    %11 = tpu.matmul %1, %10, %cst_8 {dimension_numbers = #tpu.dot_dimension_numbers<[1], [0], [0], [1], [0, 0, 1, 1], [], []>} : vector<8x512xbf16>, vector<512x32xbf16>, vector<8x32xf32> -> vector<8x32xf32>
    %12 = arith.addf %9, %11 : vector<8x32xf32>
    %c0_9 = arith.constant 0 : index
    %c0_10 = arith.constant 0 : index
    %13 = vector.load %arg4[%c0_9, %c0_10] : memref<8x32xf32, #tpu.memory_space<vmem>>, vector<8x32xf32>
    tpu.vector_store %arg4[%c0_9, %c0_10], %12 {strides = array<i32>} : memref<8x32xf32, #tpu.memory_space<vmem>>, vector<8x32xf32>,
    return
  }
  func.func @transform_0(%arg0: i32) -> (i32, i32) {
    %c0_i32 = arith.constant 0 : i32
    %c0_i32_0 = arith.constant 0 : i32
    return %arg0, %c0_i32 : i32, i32
  }
  func.func @transform_1(%arg0: i32) -> (i32, i32) {
    %c0_i32 = arith.constant 0 : i32
    %c0_i32_0 = arith.constant 0 : i32
    %c0_i32_1 = arith.constant 0 : i32
    return %c0_i32, %c0_i32_0 : i32, i32
  }
  func.func @transform_2(%arg0: i32) -> (i32, i32) {
    %c0_i32 = arith.constant 0 : i32
    %c0_i32_0 = arith.constant 0 : i32
    %c0_i32_1 = arith.constant 0 : i32
    return %c0_i32, %c0_i32_0 : i32, i32
  }
  func.func @transform_3(%arg0: i32) -> (i32, i32) {
    %c0_i32 = arith.constant 0 : i32
    %c0_i32_0 = arith.constant 0 : i32
    return %arg0, %c0_i32 : i32, i32
  }
}

</mosaic_0001>

<bundles_post_ra>
// kernel: model_forward.1
= control target key start
LH: loop header
LB: loop body
LE: loop exit
PB: predicated region body
PF: predicated region fallthrough
CT: control target
= control target key end

     0   :  { %vm715_vm0 = vcmask 261120   ;;  %s1384_s1 = inlined_call_operand.vmem [shape: bf16[512,32], index: 1, kind: input, shape index: {}]   ;;  %s1385_s0 = inlined_call_operand.vmem [shape: f32[8,512], index: 0, kind: input, shape index: {}]   ;;  %s1386_s2 = inlined_call_operand.vmem [shape: bf16[512,32], index: 2, kind: input, shape index: {}]   ;;  %s1387_s3 = inlined_call_operand.vmem [shape: f32[8,32], index: 3, kind: output, shape index: {}]  }
   0x1   :  { %v1064_v0 = vld [vmem:[%s1384_s1 + $0x38] sm:$0xff]  ;;  %v1086_v4 = vld [vmem:[%s1384_s1 + $0x30] sm:$0xff]  ;;  %v1110_v8 = vld [vmem:[%s1384_s1 + $0x28] sm:$0xff] }
   0x2   :  { %v1069_v1 = vld [vmem:[%s1384_s1 + $0x78] sm:$0xff]  ;;  %288 = vmatpush.bf16.msra.mxu0 %v1064_v0  ;;  %v1091_v5 = vld [vmem:[%s1384_s1 + $0x70] sm:$0xff]  ;;  %v1115_v9 = vld [vmem:[%s1384_s1 + $0x68] sm:$0xff] }
   0x3   :  { %v1074_v2 = vld [vmem:[%s1384_s1 + $0xb8] sm:$0xff]  ;;  %301 = vmatpush.bf16.msra.mxu1 %v1069_v1  ;;  %v1098_v6 = vld [vmem:[%s1384_s1 + $0xb0] sm:$0xff]  ;;  %v1122_v10 = vld [vmem:[%s1384_s1 + $0xa8] sm:$0xff] }
   0x4   :  { %v1079_v3 = vld [vmem:[%s1384_s1 + $0xf8] sm:$0xff]  ;;  %314 = vmatpush.bf16.msra.mxu2 %v1074_v2  ;;  %v1103_v7 = vld [vmem:[%s1384_s1 + $0xf0] sm:$0xff]  ;;  %v1127_v11 = vld [vmem:[%s1384_s1 + $0xe8] sm:$0xff] }
   0x5   :  { %327 = vmatpush.bf16.msra.mxu3 %v1079_v3  ;;  %v1134_v12 = vld [vmem:[%s1384_s1 + $0x20] sm:$0xff]  ;;  %v1156_v16 = vld [vmem:[%s1384_s1 + $0x18] sm:$0xff]  ;;  %v16_v20 = vld [vmem:[%s1385_s0 + $0x10] sm:$0xff] }
   0x6   :  { %289 = vmatpush.bf16.msra.mxu0 %v1086_v4  ;;  %v1139_v13 = vld [vmem:[%s1384_s1 + $0x60] sm:$0xff]  ;;  %v1161_v17 = vld [vmem:[%s1384_s1 + $0x58] sm:$0xff]  ;;  %v15_v23 = vld [vmem:[%s1385_s0 + $0x8] sm:$0xff] }
   0x7   :  { %302 = vmatpush.bf16.msra.mxu1 %v1091_v5  ;;  %v1146_v14 = vld [vmem:[%s1384_s1 + $0xa0] sm:$0xff]  ;;  %v1168_v18 = vld [vmem:[%s1384_s1 + $0x98] sm:$0xff]  ;;  %v1194_v24 = vld [vmem:[%s1384_s1 + $0x10] sm:$0xff] }
   0x8   :  { %315 = vmatpush.bf16.msra.mxu2 %v1098_v6  ;;  %v1151_v15 = vld [vmem:[%s1384_s1 + $0xe0] sm:$0xff]  ;;  %v1173_v19 = vld [vmem:[%s1384_s1 + $0xd8] sm:$0xff]  ;;  %v1199_v25 = vld [vmem:[%s1384_s1 + $0x50] sm:$0xff] }
   0x9   :  { %328 = vmatpush.bf16.msra.mxu3 %v1103_v7  ;;  %v17_v21 = vld [vmem:[%s1385_s0 + $0x18] sm:$0xff]  ;;  %v14_v22 = vld [vmem:[%s1385_s0] sm:$0xff]  ;;  %v995_v28 = vld [vmem:[%s1384_s1 + $0x90] sm:$0xff] }
   0xa   :  { %290 = vmatpush.bf16.msra.mxu0 %v1110_v8  ;;  %v1201_v26 = vpack.c.bf16 %v17_v21, %v16_v20  ;;  %v1203_v27 = vpack.c.bf16 %v15_v23, %v14_v22  ;;  %v1003_v29 = vld [vmem:[%s1384_s1 + $0xd0] sm:$0xff]  ;;  %v978_v30 = vld [vmem:[%s1384_s1 + $0x8] sm:$0xff]  ;;  %v977_v38 = vld [vmem:[%s1384_s1] sm:$0xff] }
   0xb   :  { %303 = vmatpush.bf16.msra.mxu1 %v1115_v9  ;;  %v986_v31 = vld [vmem:[%s1384_s1 + $0x48] sm:$0xff]  ;;  %v985_v39 = vld [vmem:[%s1384_s1 + $0x40] sm:$0xff]  ;;  %v1016_v54 = vld [vmem:[%s1386_s2 + $0x38] sm:$0xff] }
   0xc   :  { %316 = vmatpush.bf16.msra.mxu2 %v1122_v10  ;;  %v22_v32 = vunpack.c.l.bf16 %v1201_v26  ;;  %v20_v33 = vunpack.c.l.bf16 %v1203_v27  ;;  %v994_v34 = vld [vmem:[%s1384_s1 + $0x88] sm:$0xff]  ;;  %v23_v36 = vunpack.c.h.bf16 %v1201_v26  ;;  %v21_v37 = vunpack.c.h.bf16 %v1203_v27  ;;  %v993_v42 = vld [vmem:[%s1384_s1 + $0x80] sm:$0xff]  ;;  %v1024_v55 = vld [vmem:[%s1386_s2 + $0x78] sm:$0xff] }
   0xd   :  { %329 = vmatpush.bf16.msra.mxu3 %v1127_v11  ;;  %v1002_v35 = vld [vmem:[%s1384_s1 + $0xc8] sm:$0xff]  ;;  %v1001_v43 = vld [vmem:[%s1384_s1 + $0xc0] sm:$0xff]  ;;  %v344_v50 = vunpack.c.l.b16 %v1201_v26  ;;  %v342_v51 = vunpack.c.l.b16 %v1203_v27  ;;  %v345_v52 = vunpack.c.h.b16 %v1201_v26  ;;  %v343_v53 = vunpack.c.h.b16 %v1203_v27  ;;  %v1032_v56 = vld [vmem:[%s1386_s2 + $0xb8] sm:$0xff] }
   0xe   :  { %291 = vmatpush.bf16.msra.mxu0 %v1134_v12  ;;  %v26_v40 = vsub.f32 %v16_v20, %v22_v32  ;;  %v24_v41 = vsub.f32 %v14_v22, %v20_v33  ;;  %v27_v44 = vsub.f32 %v17_v21, %v23_v36  ;;  %v25_v45 = vsub.f32 %v15_v23, %v21_v37  ;;  %v1040_v57 = vld [vmem:[%s1386_s2 + $0xf8] sm:$0xff]  ;;  %v1015_v62 = vld [vmem:[%s1386_s2 + $0x30] sm:$0xff]  ;;  %v1026_v20 = vld [vmem:[%s1386_s2 + $0x88] sm:$0xff] }
   0xf   :  { %304 = vmatpush.bf16.msra.mxu1 %v1139_v13  ;;  %v1281_v58 = vpack.c.b16 %v344_v50, %v344_v50  ;;  %v1283_v59 = vpack.c.b16 %v342_v51, %v342_v51  ;;  %v1285_v60 = vpack.c.b16 %v345_v52, %v345_v52  ;;  %v1287_v61 = vpack.c.b16 %v343_v53, %v343_v53  ;;  %v1023_v63 = vld [vmem:[%s1386_s2 + $0x70] sm:$0xff]  ;;  %v1034_v21 = vld [vmem:[%s1386_s2 + $0xc8] sm:$0xff]  ;;  %v1009_v22 = vld [vmem:[%s1386_s2] sm:$0xff] }
  0x10   :  { %317 = vmatpush.bf16.msra.mxu2 %v1146_v14  ;;  %v30_v46 = vpack.c.bf16 %v26_v40, %v26_v40  ;;  %v28_v47 = vpack.c.bf16 %v24_v41, %v24_v41  ;;  %v31_v48 = vpack.c.bf16 %v27_v44, %v27_v44  ;;  %v29_v49 = vpack.c.bf16 %v25_v45, %v25_v45  ;;  %v1017_v23 = vld [vmem:[%s1386_s2 + $0x40] sm:$0xff] }
  0x11   :  { %330 = vmatpush.bf16.msra.mxu3 %v1151_v15 }
  0x12   :  { %292 = vmatpush.bf16.msra.mxu0 %v1156_v16 }
  0x13   :  { %305 = vmatpush.bf16.msra.mxu1 %v1161_v17 }
  0x14   :  { %318 = vmatpush.bf16.msra.mxu2 %v1168_v18 }
  0x15   :  { %331 = vmatpush.bf16.msra.mxu3 %v1173_v19 }
  0x16   :  { %293 = vmatpush.bf16.msra.mxu0 %v1194_v24 }
  0x17   :  { %306 = vmatpush.bf16.msra.mxu1 %v1199_v25 }
  0x18   :  { %319 = vmatpush.bf16.msra.mxu2 %v995_v28 }
  0x19   :  { %332 = vmatpush.bf16.msra.mxu3 %v1003_v29 }
  0x1a   :  { %294 = vmatpush.bf16.msra.mxu0 %v978_v30 }
  0x1b   :  { %307 = vmatpush.bf16.msra.mxu1 %v986_v31 }
  0x1c   :  { %320 = vmatpush.bf16.msra.mxu2 %v994_v34 }
  0x1d   :  { %333 = vmatpush.bf16.msra.mxu3 %v1002_v35 }
  0x1e   :  { %295 = vmatpush.bf16.msra.mxu0 %v977_v38 }
  0x1f   :  { %308 = vmatpush.bf16.msra.mxu1 %v985_v39 }
  0x20   :  { %321 = vmatpush.bf16.msra.mxu2 %v993_v42 }
  0x21   :  { %334 = vmatpush.bf16.msra.mxu3 %v1001_v43  ;;  %296 = vmatmul.bf16.vlgmr.msra.gmra.mxu0 %v28_v47 }
  0x22   :  { %354 = vmatpush.bf16.msrb.mxu0 %v1064_v0  ;;  %309 = vmatmul.bf16.vlgmr.msra.gmra.mxu1 %v29_v49  ;;  %v1031_v0 = vld [vmem:[%s1386_s2 + $0xb0] sm:$0xff] }
  0x23   :  { %367 = vmatpush.bf16.msrb.mxu1 %v1069_v1  ;;  %322 = vmatmul.bf16.vlgmr.msra.gmra.mxu2 %v30_v46  ;;  %v1039_v1 = vld [vmem:[%s1386_s2 + $0xf0] sm:$0xff] }
  0x24   :  { %380 = vmatpush.bf16.msrb.mxu2 %v1074_v2  ;;  %335 = vmatmul.bf16.vlgmr.msra.gmra.mxu3 %v31_v48  ;;  %v1014_v2 = vld [vmem:[%s1386_s2 + $0x28] sm:$0xff] }
  0x25   :  { %393 = vmatpush.bf16.msrb.mxu3 %v1079_v3  ;;  %v1022_v3 = vld [vmem:[%s1386_s2 + $0x68] sm:$0xff] }
  0x26   :  { %355 = vmatpush.bf16.msrb.mxu0 %v1086_v4  ;;  %v1030_v4 = vld [vmem:[%s1386_s2 + $0xa8] sm:$0xff] }
  0x27   :  { %368 = vmatpush.bf16.msrb.mxu1 %v1091_v5  ;;  %v1038_v5 = vld [vmem:[%s1386_s2 + $0xe8] sm:$0xff] }
  0x28   :  { %381 = vmatpush.bf16.msrb.mxu2 %v1098_v6  ;;  %v1013_v6 = vld [vmem:[%s1386_s2 + $0x20] sm:$0xff] }
  0x29   :  { %394 = vmatpush.bf16.msrb.mxu3 %v1103_v7  ;;  %v1021_v7 = vld [vmem:[%s1386_s2 + $0x60] sm:$0xff] }
  0x2a   :  { %356 = vmatpush.bf16.msrb.mxu0 %v1110_v8  ;;  %v1029_v8 = vld [vmem:[%s1386_s2 + $0xa0] sm:$0xff] }
  0x2b   :  { %369 = vmatpush.bf16.msrb.mxu1 %v1115_v9  ;;  %v1037_v9 = vld [vmem:[%s1386_s2 + $0xe0] sm:$0xff] }
  0x2c   :  { %382 = vmatpush.bf16.msrb.mxu2 %v1122_v10  ;;  %v1012_v10 = vld [vmem:[%s1386_s2 + $0x18] sm:$0xff] }
  0x2d   :  { %395 = vmatpush.bf16.msrb.mxu3 %v1127_v11  ;;  %v1020_v11 = vld [vmem:[%s1386_s2 + $0x58] sm:$0xff] }
  0x2e   :  { %357 = vmatpush.bf16.msrb.mxu0 %v1134_v12  ;;  %v1028_v12 = vld [vmem:[%s1386_s2 + $0x98] sm:$0xff] }
  0x2f   :  { %370 = vmatpush.bf16.msrb.mxu1 %v1139_v13  ;;  %v1036_v13 = vld [vmem:[%s1386_s2 + $0xd8] sm:$0xff] }
  0x30   :  { %383 = vmatpush.bf16.msrb.mxu2 %v1146_v14  ;;  %v1011_v14 = vld [vmem:[%s1386_s2 + $0x10] sm:$0xff] }
  0x31   :  { %396 = vmatpush.bf16.msrb.mxu3 %v1151_v15  ;;  %v1019_v15 = vld [vmem:[%s1386_s2 + $0x50] sm:$0xff] }
  0x32   :  { %358 = vmatpush.bf16.msrb.mxu0 %v1156_v16  ;;  %v1027_v16 = vld [vmem:[%s1386_s2 + $0x90] sm:$0xff] }
  0x33   :  { %371 = vmatpush.bf16.msrb.mxu1 %v1161_v17  ;;  %v1035_v17 = vld [vmem:[%s1386_s2 + $0xd0] sm:$0xff] }
  0x34   :  { %384 = vmatpush.bf16.msrb.mxu2 %v1168_v18  ;;  %v1010_v18 = vld [vmem:[%s1386_s2 + $0x8] sm:$0xff] }
  0x35   :  { %397 = vmatpush.bf16.msrb.mxu3 %v1173_v19  ;;  %v1018_v19 = vld [vmem:[%s1386_s2 + $0x48] sm:$0xff] }
  0x36   :  { %359 = vmatpush.bf16.msrb.mxu0 %v1194_v24  ;;  %v1025_v24 = vld [vmem:[%s1386_s2 + $0x80] sm:$0xff] }
  0x37   :  { %372 = vmatpush.bf16.msrb.mxu1 %v1199_v25  ;;  %v1033_v25 = vld [vmem:[%s1386_s2 + $0xc0] sm:$0xff] }
  0x38   :  { %385 = vmatpush.bf16.msrb.mxu2 %v995_v28 }
  0x39   :  { %398 = vmatpush.bf16.msrb.mxu3 %v1003_v29 }
  0x3a   :  { %360 = vmatpush.bf16.msrb.mxu0 %v978_v30 }
  0x3b   :  { %373 = vmatpush.bf16.msrb.mxu1 %v986_v31 }
  0x3c   :  { %386 = vmatpush.bf16.msrb.mxu2 %v994_v34 }
  0x3d   :  { %399 = vmatpush.bf16.msrb.mxu3 %v1002_v35 }
  0x3e   :  { %361 = vmatpush.bf16.msrb.mxu0 %v977_v38 }
  0x3f   :  { %374 = vmatpush.bf16.msrb.mxu1 %v985_v39 }
  0x40   :  { %387 = vmatpush.bf16.msrb.mxu2 %v993_v42 }
  0x41   :  { %400 = vmatpush.bf16.msrb.mxu3 %v1001_v43  ;;  %362 = vmatmul.bf16.vlgmr.msrb.gmra.mxu0 %v1283_v59 }
  0x42   :  { %662 = vmatpush.bf16.msra.mxu0 %v1016_v54  ;;  %375 = vmatmul.bf16.vlgmr.msrb.gmra.mxu1 %v1287_v61 }
  0x43   :  { %675 = vmatpush.bf16.msra.mxu1 %v1024_v55  ;;  %388 = vmatmul.bf16.vlgmr.msrb.gmra.mxu2 %v1281_v58 }
  0x44   :  { %688 = vmatpush.bf16.msra.mxu2 %v1032_v56  ;;  %401 = vmatmul.bf16.vlgmr.msrb.gmra.mxu3 %v1285_v60 }
  0x45   :  { %701 = vmatpush.bf16.msra.mxu3 %v1040_v57 }
  0x46   :  { %663 = vmatpush.bf16.msra.mxu0 %v1015_v62 }
  0x47   :  { %676 = vmatpush.bf16.msra.mxu1 %v1023_v63 }
  0x48   :  { %689 = vmatpush.bf16.msra.mxu2 %v1031_v0 }
  0x49   :  { %702 = vmatpush.bf16.msra.mxu3 %v1039_v1 }
  0x4a   :  { %664 = vmatpush.bf16.msra.mxu0 %v1014_v2 }
  0x4b   :  { %677 = vmatpush.bf16.msra.mxu1 %v1022_v3 }
  0x4c   :  { %690 = vmatpush.bf16.msra.mxu2 %v1030_v4 }
  0x4d   :  { %703 = vmatpush.bf16.msra.mxu3 %v1038_v5 }
  0x4e   :  { %665 = vmatpush.bf16.msra.mxu0 %v1013_v6 }
  0x4f   :  { %678 = vmatpush.bf16.msra.mxu1 %v1021_v7 }
  0x50   :  { %691 = vmatpush.bf16.msra.mxu2 %v1029_v8 }
  0x51   :  { %704 = vmatpush.bf16.msra.mxu3 %v1037_v9 }
  0x52   :  { %666 = vmatpush.bf16.msra.mxu0 %v1012_v10 }
  0x53   :  { %679 = vmatpush.bf16.msra.mxu1 %v1020_v11 }
  0x54   :  { %692 = vmatpush.bf16.msra.mxu2 %v1028_v12 }
  0x55   :  { %705 = vmatpush.bf16.msra.mxu3 %v1036_v13 }
  0x56   :  { %667 = vmatpush.bf16.msra.mxu0 %v1011_v14 }
  0x57   :  { %680 = vmatpush.bf16.msra.mxu1 %v1019_v15 }
  0x58   :  { %693 = vmatpush.bf16.msra.mxu2 %v1027_v16 }
  0x59   :  { %706 = vmatpush.bf16.msra.mxu3 %v1035_v17 }
  0x5a   :  { %668 = vmatpush.bf16.msra.mxu0 %v1010_v18 }
  0x5b   :  { %681 = vmatpush.bf16.msra.mxu1 %v1018_v19 }
  0x5c   :  { %694 = vmatpush.bf16.msra.mxu2 %v1026_v20 }
  0x5d   :  { %707 = vmatpush.bf16.msra.mxu3 %v1034_v21 }
  0x5e   :  { %669 = vmatpush.bf16.msra.mxu0 %v1009_v22 }
  0x5f   :  { %682 = vmatpush.bf16.msra.mxu1 %v1017_v23 }
  0x60   :  { %695 = vmatpush.bf16.msra.mxu2 %v1025_v24 }
  0x61   :  { %708 = vmatpush.bf16.msra.mxu3 %v1033_v25  ;;  %670 = vmatmul.bf16.vlgmr.msra.gmra.mxu0 %v1283_v59 }
  0x62   :  { %683 = vmatmul.bf16.vlgmr.msra.gmra.mxu1 %v1287_v61 }
  0x63   :  { %696 = vmatmul.bf16.vlgmr.msra.gmra.mxu2 %v1281_v58 }
  0x64   :  { %709 = vmatmul.bf16.vlgmr.msra.gmra.mxu3 %v1285_v60 }
  0x9e   :  { %v297_v26 = vpop.f32.mrf.mxu0 }
  0x9f   :  { %v310_v27 = vpop.f32.mrf.mxu1 }
  0xa0   :  { %v311_v41 = vadd.f32 %v310_v27, %v297_v26 }
  0xa6   :  { %v323_v28 = vpop.f32.mrf.mxu2  ;;  %v299_v30 = vpop.f32.mrf.mxu0 }
  0xa7   :  { %v336_v29 = vpop.f32.mrf.mxu3  ;;  %v312_v31 = vpop.f32.mrf.mxu1  ;;  %v324_v43 = vadd.f32 %v323_v28, %v311_v41 }
  0xa9   :  { %v337_v44 = vadd.f32 %v336_v29, %v324_v43 }
  0xae   :  { %v325_v32 = vpop.f32.mrf.mxu2 }
  0xaf   :  { %v338_v33 = vpop.f32.mrf.mxu3 }
  0xbe   :  { %v363_v34 = vpop.f32.mrf.mxu0 }
  0xbf   :  { %v376_v35 = vpop.f32.mrf.mxu1  ;;  %v364_v45 = vadd.f32 %v363_v34, %v337_v44 }
  0xc1   :  { %v377_v48 = vadd.f32 %v376_v35, %v364_v45 }
  0xc6   :  { %v389_v36 = vpop.f32.mrf.mxu2  ;;  %v365_v38 = vpop.f32.mrf.mxu0 }
  0xc7   :  { %v402_v37 = vpop.f32.mrf.mxu3  ;;  %v378_v39 = vpop.f32.mrf.mxu1  ;;  %v390_v50 = vadd.f32 %v389_v36, %v377_v48 }
  0xc9   :  { %v403_v56 = vadd.f32 %v402_v37, %v390_v50 }
  0xce   :  { %v391_v40 = vpop.f32.mrf.mxu2 }
  0xcf   :  { %v404_v42 = vpop.f32.mrf.mxu3 }
  0xde   :  { %v671_v46 = vpop.f32.mrf.mxu0 }
  0xdf   :  { %v684_v47 = vpop.f32.mrf.mxu1 }
  0xe0   :  { %v685_v49 = vadd.f32 %v684_v47, %v671_v46 }
  0xe6   :  { %v697_v51 = vpop.f32.mrf.mxu2  ;;  %v673_v54 = vpop.f32.mrf.mxu0 }
  0xe7   :  { %v710_v52 = vpop.f32.mrf.mxu3  ;;  %v698_v53 = vadd.f32 %v697_v51, %v685_v49  ;;  %v686_v55 = vpop.f32.mrf.mxu1 }
  0xe9   :  { %v711_v57 = vadd.f32 %v710_v52, %v698_v53 }
  0xeb   :  { %v714_v58 = vadd.f32 %v711_v57, %v403_v56 }
  0xed   :  { %716 = vst.msk [vmem:[%s1387_s3] sm:$0xff] %vm715_vm0, %v714_v58 }
  0xee   :  { %v699_v59 = vpop.f32.mrf.mxu2 }
  0xef   :  { %v712_v60 = vpop.f32.mrf.mxu3 }

</bundles_post_ra>
